<compile_context>
chip_gen: v5e
topology: v5e:2x2
jax: 0.10.0
libtpu: 0.0.40
codegen_flags: <defaults>
</compile_context>

<pallas_src>
import functools

import jax
import jax.numpy as jnp
from jax import lax
from jax.experimental import pallas as pl
from jax.experimental.pallas import tpu as pltpu


def _cdiv(a: int, b: int) -> int:
    return (a + b - 1) // b


def _round_up(a: int, b: int) -> int:
    return _cdiv(a, b) * b


def _patch_proj_kernel(p_ref, w_ref, b_ref, o_ref):
    # p_ref: (TM, K) bf16 patch tile        (double-buffered over the M grid)
    # w_ref: (K, E)  bf16 projection weight (constant index_map -> VMEM-resident)
    # b_ref: (1, E)  f32  bias              (constant index_map -> VMEM-resident)
    # o_ref: (TM, E) output tile
    acc = jnp.dot(p_ref[...], w_ref[...], preferred_element_type=jnp.float32)
    o_ref[...] = (acc + b_ref[...]).astype(o_ref.dtype)


def prepare_patch_embed_params(weight, bias):
    """One-time repack of Conv2d params into the kernel layout.

    weight: (E, C, pH, pW) -> (K, E) bf16 with K ordered (c, kh, kw)
    bias:   (E,)           -> (1, E) f32
    Hoisted out of the per-call path (avoids a per-call transpose kernel).
    """
    E = weight.shape[0]
    K = int(weight.shape[1] * weight.shape[2] * weight.shape[3])
    w_mat = jnp.asarray(weight).reshape(E, K).T.astype(jnp.bfloat16)
    b_mat = jnp.asarray(bias).reshape(1, E).astype(jnp.float32)
    return w_mat, b_mat


@functools.partial(
    jax.jit,
    static_argnames=("patch_size", "tile_m", "out_dtype", "allow_input_fusion"))
def patch_embed_2d(x, w_mat, b_mat, patch_size, *, tile_m: int = 1024,
                   out_dtype=None, allow_input_fusion: bool = True):
    """x: (B, C, H, W); w_mat: (K, E) bf16; b_mat: (1, E) f32.

    Returns (B, Np, E) with Np = (H // pH) * (W // pW), matching
    Conv2d(stride=kernel=patch_size) -> flatten(2) -> transpose(1, 2)
    (norm_layer=None -> Identity).
    """
    pH, pW = patch_size
    B, C, H, W = x.shape
    K, E = w_mat.shape
    if H % pH != 0 or W % pW != 0:
        raise ValueError(
            f"Spatial dims ({H},{W}) must be divisible by patch_size ({pH},{pW})")
    if K != C * pH * pW:
        raise ValueError(f"weight K={K} does not match C*pH*pW={C * pH * pW}")
    Hp, Wp = H // pH, W // pW
    Np = Hp * Wp
    M = B * Np
    out_dtype = x.dtype if out_dtype is None else out_dtype
    out_itemsize = jnp.dtype(out_dtype).itemsize

    # --- patchify: pure layout, no compute.  K ordering (c, kh, kw) matches
    # prepare_patch_embed_params.  With allow_input_fusion this producer fuses
    # into the kernel's input DMA; otherwise XLA emits one transpose+cast copy
    # (read f32, write bf16).
    patches = x.reshape(B, C, Hp, pH, Wp, pW)
    patches = jnp.transpose(patches, (0, 2, 4, 1, 3, 5)).reshape(M, K)
    patches = patches.astype(jnp.bfloat16)     # bf16 MXU inputs, f32 accumulate

    # --- pad M only up to the sublane multiple of 8 (<= 7 rows).  No full-tile
    # pad: the ragged last grid block is masked by Pallas and out[:M] drops it.
    M8 = _round_up(M, 8)
    if M8 != M:
        patches = jnp.pad(patches, ((0, M8 - M), (0, 0)))

    # --- M tiling: cap at tile_m; keep the tile count even when > 1 so the
    # "parallel" axis balances across v7x's two TensorCores (no-op on 1-TC chips).
    n_tiles = _cdiv(M8, max(8, tile_m))
    if n_tiles > 1 and n_tiles % 2 == 1:
        n_tiles += 1
    tm = _round_up(_cdiv(M8, n_tiles), 8)
    grid = (_cdiv(M8, tm),)

    # --- explicit scoped-VMEM budget: double-buffered patches + output tiles,
    # (conservatively) double-buffered resident weight/bias, plus slack.
    working_set = 2 * (tm * K * 2 + tm * E * out_itemsize + K * E * 2 + E * 4)
    vmem_limit_bytes = int(min(64 << 20, max(16 << 20, working_set + (4 << 20))))

    cost = pl.CostEstimate(
        flops=2 * M8 * K * E,
        bytes_accessed=M8 * K * 2 + K * E * 2 + E * 4 + M8 * E * out_itemsize,
        transcendentals=0,
    )

    out = pl.pallas_call(
        _patch_proj_kernel,
        out_shape=jax.ShapeDtypeStruct((M8, E), out_dtype),
        grid=grid,
        in_specs=[
            pl.BlockSpec((tm, K), lambda i: (i, 0)),   # patches: tiled over M
            pl.BlockSpec((K, E), lambda i: (0, 0)),    # weight:  VMEM-resident
            pl.BlockSpec((1, E), lambda i: (0, 0)),    # bias:    VMEM-resident
        ],
        out_specs=pl.BlockSpec((tm, E), lambda i: (i, 0)),
        compiler_params=pltpu.CompilerParams(
            dimension_semantics=("parallel",),         # shard M over TCs (v7x)
            vmem_limit_bytes=vmem_limit_bytes,
            allow_input_fusion=(
                [True, False, False] if allow_input_fusion else None),
        ),
        cost_estimate=cost,
    )(patches, w_mat, b_mat)

    # flatten(2).transpose(1, 2) semantics: (B, Np, E)
    return out[:M].reshape(B, Np, E)


if __name__ == "__main__":
    # Small shapes consistent with the module (scaled down):
    # batch=2, in_chans=4, spatial=16x16, patch_size=8, embed_dim=128.
    B, C, H, W = 2, 4, 16, 16
    patch_size = (8, 8)
    E = 128

    key = jax.random.PRNGKey(0)
    kx, kw, kb = jax.random.split(key, 3)
    x = jax.random.normal(kx, (B, C, H, W), dtype=jnp.float32)
    weight = jax.random.normal(kw, (E, C, patch_size[0], patch_size[1]),
                               dtype=jnp.float32) * 0.02
    bias = jax.random.normal(kb, (E,), dtype=jnp.float32) * 0.02

    # One-time parameter repack (hoisted out of the per-call path).
    w_mat, b_mat = prepare_patch_embed_params(weight, bias)

    try:
        out = jax.block_until_ready(patch_embed_2d(x, w_mat, b_mat, patch_size))
    except Exception:
        # This compiler version rejected fusing the patchify producer into the
        # kernel input; fall back to the (still correct) un-fused path.
        out = jax.block_until_ready(
            patch_embed_2d(x, w_mat, b_mat, patch_size,
                           allow_input_fusion=False))

    # Reference: f32 strided conv (== PyTorch Conv2d kernel=stride=patch_size),
    # then flatten(2).transpose(1, 2).  Kernel uses bf16 MXU inputs with f32
    # accumulation -> compare with a bf16-appropriate tolerance.
    ref = lax.conv_general_dilated(
        x, weight, window_strides=patch_size, padding="VALID",
        dimension_numbers=("NCHW", "OIHW", "NCHW"),
    ) + bias.reshape(1, E, 1, 1)
    ref = ref.reshape(B, E, -1).transpose(0, 2, 1)

    Np = (H // patch_size[0]) * (W // patch_size[1])
    assert out.shape == (B, Np, E), out.shape
    assert jnp.allclose(out.astype(jnp.float32), ref, atol=3e-2, rtol=3e-2), (
        float(jnp.max(jnp.abs(out.astype(jnp.float32) - ref))))
    print("KERNEL_OK")
</pallas_src>

<mosaic_0001>
module attributes {stable_mosaic.version = 11 : i64} {
  func.func @_patch_proj_kernel(%arg0: i32, %arg1: memref<8x256xbf16, #tpu.memory_space<vmem>>, %arg2: memref<256x128xbf16, #tpu.memory_space<vmem>>, %arg3: memref<1x128xf32, #tpu.memory_space<vmem>>, %arg4: memref<8x128xf32, #tpu.memory_space<vmem>>) attributes {dimension_semantics = [#tpu.dimension_semantics<parallel>], iteration_bounds = array<i64: 1>, scalar_prefetch = 0 : i64, scratch_operands = 0 : i64, tpu.core_type = #tpu.core_type<tc>, window_params = [{transform_indices = @transform_0, window_bounds = array<i64: 8, 256>}, {pipeline_mode = #tpu.pipeline_mode<synchronous>, transform_indices = @transform_1, window_bounds = array<i64: 256, 128>}, {pipeline_mode = #tpu.pipeline_mode<synchronous>, transform_indices = @transform_2, window_bounds = array<i64: 1, 128>}, {transform_indices = @transform_3, window_bounds = array<i64: 8, 128>}]} {
    %c0 = arith.constant 0 : index
    %c0_0 = arith.constant 0 : index
    %0 = vector.load %arg1[%c0, %c0_0] : memref<8x256xbf16, #tpu.memory_space<vmem>>, vector<8x256xbf16>
    %c0_1 = arith.constant 0 : index
    %c0_2 = arith.constant 0 : index
    %1 = vector.load %arg2[%c0_1, %c0_2] : memref<256x128xbf16, #tpu.memory_space<vmem>>, vector<256x128xbf16>
    %cst = arith.constant dense<0.000000e+00> : vector<8x128xf32>
    %2 = tpu.matmul %0, %1, %cst {dimension_numbers = #tpu.dot_dimension_numbers<[1], [0], [0], [1], [0, 0, 1, 1], [], []>} : vector<8x256xbf16>, vector<256x128xbf16>, vector<8x128xf32> -> vector<8x128xf32>
    %c0_3 = arith.constant 0 : index
    %c0_4 = arith.constant 0 : index
    %3 = vector.load %arg3[%c0_3, %c0_4] : memref<1x128xf32, #tpu.memory_space<vmem>>, vector<1x128xf32>
    %4 = vector.broadcast %3 : vector<1x128xf32> to vector<8x128xf32>
    %5 = arith.addf %2, %4 : vector<8x128xf32>
    %c0_5 = arith.constant 0 : index
    %c0_6 = arith.constant 0 : index
    %6 = vector.load %arg4[%c0_5, %c0_6] : memref<8x128xf32, #tpu.memory_space<vmem>>, vector<8x128xf32>
    tpu.vector_store %arg4[%c0_5, %c0_6], %5 {strides = array<i32>} : memref<8x128xf32, #tpu.memory_space<vmem>>, vector<8x128xf32>,
    return
  }
  func.func @transform_0(%arg0: i32) -> (i32, i32) {
    %c0_i32 = arith.constant 0 : i32
    %c0_i32_0 = arith.constant 0 : i32
    return %arg0, %c0_i32 : i32, i32
  }
  func.func @transform_1(%arg0: i32) -> (i32, i32) {
    %c0_i32 = arith.constant 0 : i32
    %c0_i32_0 = arith.constant 0 : i32
    %c0_i32_1 = arith.constant 0 : i32
    return %c0_i32, %c0_i32_0 : i32, i32
  }
  func.func @transform_2(%arg0: i32) -> (i32, i32) {
    %c0_i32 = arith.constant 0 : i32
    %c0_i32_0 = arith.constant 0 : i32
    %c0_i32_1 = arith.constant 0 : i32
    return %c0_i32, %c0_i32_0 : i32, i32
  }
  func.func @transform_3(%arg0: i32) -> (i32, i32) {
    %c0_i32 = arith.constant 0 : i32
    %c0_i32_0 = arith.constant 0 : i32
    return %arg0, %c0_i32 : i32, i32
  }
}

module attributes {stable_mosaic.version = 11 : i64} {
  func.func @_patch_proj_kernel(%arg0: i32, %arg1: memref<8x256xbf16, #tpu.memory_space<vmem>>, %arg2: memref<256x128xbf16, #tpu.memory_space<vmem>>, %arg3: memref<1x128xf32, #tpu.memory_space<vmem>>, %arg4: memref<8x128xf32, #tpu.memory_space<vmem>>) attributes {dimension_semantics = [#tpu.dimension_semantics<parallel>], iteration_bounds = array<i64: 1>, scalar_prefetch = 0 : i64, scratch_operands = 0 : i64, tpu.core_type = #tpu.core_type<tc>, window_params = [{transform_indices = @transform_0, window_bounds = array<i64: 8, 256>}, {pipeline_mode = #tpu.pipeline_mode<synchronous>, transform_indices = @transform_1, window_bounds = array<i64: 256, 128>}, {pipeline_mode = #tpu.pipeline_mode<synchronous>, transform_indices = @transform_2, window_bounds = array<i64: 1, 128>}, {transform_indices = @transform_3, window_bounds = array<i64: 8, 128>}]} {
    %c0 = arith.constant 0 : index
    %c0_0 = arith.constant 0 : index
    %0 = vector.load %arg1[%c0, %c0_0] : memref<8x256xbf16, #tpu.memory_space<vmem>>, vector<8x256xbf16>
    %c0_1 = arith.constant 0 : index
    %c0_2 = arith.constant 0 : index
    %1 = vector.load %arg2[%c0_1, %c0_2] : memref<256x128xbf16, #tpu.memory_space<vmem>>, vector<256x128xbf16>
    %cst = arith.constant dense<0.000000e+00> : vector<8x128xf32>
    %2 = tpu.matmul %0, %1, %cst {dimension_numbers = #tpu.dot_dimension_numbers<[1], [0], [0], [1], [0, 0, 1, 1], [], []>} : vector<8x256xbf16>, vector<256x128xbf16>, vector<8x128xf32> -> vector<8x128xf32>
    %c0_3 = arith.constant 0 : index
    %c0_4 = arith.constant 0 : index
    %3 = vector.load %arg3[%c0_3, %c0_4] : memref<1x128xf32, #tpu.memory_space<vmem>>, vector<1x128xf32>
    %4 = vector.broadcast %3 : vector<1x128xf32> to vector<8x128xf32>
    %5 = arith.addf %2, %4 : vector<8x128xf32>
    %c0_5 = arith.constant 0 : index
    %c0_6 = arith.constant 0 : index
    %6 = vector.load %arg4[%c0_5, %c0_6] : memref<8x128xf32, #tpu.memory_space<vmem>>, vector<8x128xf32>
    tpu.vector_store %arg4[%c0_5, %c0_6], %5 {strides = array<i32>} : memref<8x128xf32, #tpu.memory_space<vmem>>, vector<8x128xf32>,
    return
  }
  func.func @transform_0(%arg0: i32) -> (i32, i32) {
    %c0_i32 = arith.constant 0 : i32
    %c0_i32_0 = arith.constant 0 : i32
    return %arg0, %c0_i32 : i32, i32
  }
  func.func @transform_1(%arg0: i32) -> (i32, i32) {
    %c0_i32 = arith.constant 0 : i32
    %c0_i32_0 = arith.constant 0 : i32
    %c0_i32_1 = arith.constant 0 : i32
    return %c0_i32, %c0_i32_0 : i32, i32
  }
  func.func @transform_2(%arg0: i32) -> (i32, i32) {
    %c0_i32 = arith.constant 0 : i32
    %c0_i32_0 = arith.constant 0 : i32
    %c0_i32_1 = arith.constant 0 : i32
    return %c0_i32, %c0_i32_0 : i32, i32
  }
  func.func @transform_3(%arg0: i32) -> (i32, i32) {
    %c0_i32 = arith.constant 0 : i32
    %c0_i32_0 = arith.constant 0 : i32
    return %arg0, %c0_i32 : i32, i32
  }
}

</mosaic_0001>

<bundles_post_ra>
// kernel: patch_embed_2d.1
= control target key start
LH: loop header
LB: loop body
LE: loop exit
PB: predicated region body
PF: predicated region fallthrough
CT: control target
= control target key end

     0   :  { %s384_s0 = inlined_call_operand.vmem [shape: bf16[8,256], index: 0, kind: input, shape index: {}]   ;;  %s385_s1 = inlined_call_operand.vmem [shape: bf16[256,128], index: 1, kind: input, shape index: {}]   ;;  %s386_s2 = inlined_call_operand.vmem [shape: f32[1,128], index: 2, kind: input, shape index: {}]   ;;  %s387_s3 = inlined_call_operand.hbm [shape: f32[8,128], index: 3, kind: output, shape index: {}]  }
   0x1   :  { %v269_v0 = vld [vmem:[%s385_s1 + $0x38] sm:$0xff]  ;;  %v268_v2 = vld [vmem:[%s385_s1 + $0x30] sm:$0xff]  ;;  %v267_v4 = vld [vmem:[%s385_s1 + $0x28] sm:$0xff] }
   0x2   :  { %v277_v1 = vld [vmem:[%s385_s1 + $0x78] sm:$0xff]  ;;  %155 = vmatpush.bf16.msra.mxu0 %v269_v0  ;;  %v276_v3 = vld [vmem:[%s385_s1 + $0x70] sm:$0xff]  ;;  %v275_v5 = vld [vmem:[%s385_s1 + $0x68] sm:$0xff] }
   0x3   :  { %168 = vmatpush.bf16.msra.mxu1 %v277_v1 }
   0x6   :  { %156 = vmatpush.bf16.msra.mxu0 %v268_v2 }
   0x7   :  { %169 = vmatpush.bf16.msra.mxu1 %v276_v3 }
   0x8   :  { %8 = vsyncpa [#allocation3], 0  ;;  %v266_v6 = vld [vmem:[%s385_s1 + $0x20] sm:$0xff]  ;;  %v265_v8 = vld [vmem:[%s385_s1 + $0x18] sm:$0xff]  ;;  %s306_s20 = smov [#allocation2]   ;;  %s189_s24 = sshll.u32 %s387_s3, 4  ;;  %s190_s24 = int_to_ptr.hbm [resolvable:$true] %s189_s24 }
   0x9   :  { %v274_v7 = vld [vmem:[%s385_s1 + $0x60] sm:$0xff]  ;;  %v273_v9 = vld [vmem:[%s385_s1 + $0x58] sm:$0xff]  ;;  %v264_v10 = vld [vmem:[%s385_s1 + $0x10] sm:$0xff]  ;;  %s187_s21 = sshll.u32 %s306_s20, 4  ;;  %s188_s21 = int_to_ptr.vmem [resolvable:$true] %s187_s21 }
   0xa   :  { %157 = vmatpush.bf16.msra.mxu0 %v267_v4  ;;  %v272_v11 = vld [vmem:[%s385_s1 + $0x50] sm:$0xff]  ;;  %v263_v12 = vld [vmem:[%s385_s1 + $0x8] sm:$0xff]  ;;  %v15_v14 = vld [vmem:[%s384_s0] sm:$0xff] }
   0xb   :  { %170 = vmatpush.bf16.msra.mxu1 %v275_v5  ;;  %v271_v13 = vld [vmem:[%s385_s1 + $0x48] sm:$0xff]  ;;  %v53_v15 = vunpack.c.l.b16 %v15_v14  ;;  %v54_v16 = vunpack.c.h.b16 %v15_v14  ;;  %v262_v17 = vld [vmem:[%s385_s1] sm:$0xff] }
   0xc   :  { %v270_v18 = vld [vmem:[%s385_s1 + $0x40] sm:$0xff] }
   0xd   :  { %v55_v19 = vpack.c.b16 %v53_v15, %v53_v15  ;;  %v56_v20 = vpack.c.b16 %v54_v16, %v54_v16  ;;  %v279_v21 = vld [vmem:[%s386_s2] ss:$0 sm:$0xff] }
   0xe   :  { %158 = vmatpush.bf16.msra.mxu0 %v266_v6 }
   0xf   :  { %171 = vmatpush.bf16.msra.mxu1 %v274_v7 }
  0x12   :  { %159 = vmatpush.bf16.msra.mxu0 %v265_v8 }
  0x13   :  { %172 = vmatpush.bf16.msra.mxu1 %v273_v9 }
  0x16   :  { %160 = vmatpush.bf16.msra.mxu0 %v264_v10 }
  0x17   :  { %173 = vmatpush.bf16.msra.mxu1 %v272_v11 }
  0x1a   :  { %161 = vmatpush.bf16.msra.mxu0 %v263_v12 }
  0x1b   :  { %174 = vmatpush.bf16.msra.mxu1 %v271_v13 }
  0x1e   :  { %162 = vmatpush.bf16.msra.mxu0 %v262_v17 }
  0x1f   :  { %175 = vmatpush.bf16.msra.mxu1 %v270_v18 }
  0x21   :  { %163 = vmatmul.bf16.vlgmr.msra.gmra.mxu0 %v55_v19 }
  0x22   :  { %176 = vmatmul.bf16.vlgmr.msra.gmra.mxu1 %v56_v20 }
  0x9e   :  { %v164_v22 = vpop.f32.mrf.mxu0 }
  0x9f   :  { %v177_v23 = vpop.f32.mrf.mxu1  ;;  %v165_v24 = vadd.f32 %v279_v21, %v164_v22 }
  0xa1   :  { %v178_v25 = vadd.f32 %v177_v23, %v165_v24 }
  0xa3   :  { %181 = vst [vmem:[#allocation2] sm:$0xff] %v178_v25 }
  0xa4   :  { %192 = dma.vmem_to_hbm [thread:$0]  %s188_s21, 128, %s190_s24, [#allocation3]  }
  0xa6   :  { %v166_v26 = vpop.f32.mrf.mxu0 }
  0xa7   :  { %v179_v27 = vpop.f32.mrf.mxu1 }
  0xa8   :  { %304 = dma.done.wait [#allocation3], 128  }
  0xa9   :  { %305 = vsyncadd [#allocation3], 4294967168 }
  0xaa   :  { %197 = vsyncpa [#allocation3], 1 }

// kernel: patch_embed_2d.1
= control target key start
LH: loop header
LB: loop body
LE: loop exit
PB: predicated region body
PF: predicated region fallthrough
CT: control target
= control target key end

     0   :  { %s384_s0 = inlined_call_operand.vmem [shape: bf16[8,256], index: 0, kind: input, shape index: {}]   ;;  %s385_s1 = inlined_call_operand.vmem [shape: bf16[256,128], index: 1, kind: input, shape index: {}]   ;;  %s386_s2 = inlined_call_operand.vmem [shape: f32[1,128], index: 2, kind: input, shape index: {}]   ;;  %s387_s3 = inlined_call_operand.hbm [shape: f32[8,128], index: 3, kind: output, shape index: {}]  }
   0x1   :  { %v269_v0 = vld [vmem:[%s385_s1 + $0x38] sm:$0xff]  ;;  %v268_v2 = vld [vmem:[%s385_s1 + $0x30] sm:$0xff]  ;;  %v267_v4 = vld [vmem:[%s385_s1 + $0x28] sm:$0xff] }
   0x2   :  { %v277_v1 = vld [vmem:[%s385_s1 + $0x78] sm:$0xff]  ;;  %155 = vmatpush.bf16.msra.mxu0 %v269_v0  ;;  %v276_v3 = vld [vmem:[%s385_s1 + $0x70] sm:$0xff]  ;;  %v275_v5 = vld [vmem:[%s385_s1 + $0x68] sm:$0xff] }
   0x3   :  { %168 = vmatpush.bf16.msra.mxu1 %v277_v1 }
   0x6   :  { %156 = vmatpush.bf16.msra.mxu0 %v268_v2 }
   0x7   :  { %169 = vmatpush.bf16.msra.mxu1 %v276_v3 }
   0x8   :  { %8 = vsyncpa [#allocation3], 0  ;;  %v266_v6 = vld [vmem:[%s385_s1 + $0x20] sm:$0xff]  ;;  %v265_v8 = vld [vmem:[%s385_s1 + $0x18] sm:$0xff]  ;;  %s306_s20 = smov [#allocation2]   ;;  %s189_s24 = sshll.u32 %s387_s3, 4  ;;  %s190_s24 = int_to_ptr.hbm [resolvable:$true] %s189_s24 }
   0x9   :  { %v274_v7 = vld [vmem:[%s385_s1 + $0x60] sm:$0xff]  ;;  %v273_v9 = vld [vmem:[%s385_s1 + $0x58] sm:$0xff]  ;;  %v264_v10 = vld [vmem:[%s385_s1 + $0x10] sm:$0xff]  ;;  %s187_s21 = sshll.u32 %s306_s20, 4  ;;  %s188_s21 = int_to_ptr.vmem [resolvable:$true] %s187_s21 }
   0xa   :  { %157 = vmatpush.bf16.msra.mxu0 %v267_v4  ;;  %v272_v11 = vld [vmem:[%s385_s1 + $0x50] sm:$0xff]  ;;  %v263_v12 = vld [vmem:[%s385_s1 + $0x8] sm:$0xff]  ;;  %v15_v14 = vld [vmem:[%s384_s0] sm:$0xff] }
   0xb   :  { %170 = vmatpush.bf16.msra.mxu1 %v275_v5  ;;  %v271_v13 = vld [vmem:[%s385_s1 + $0x48] sm:$0xff]  ;;  %v53_v15 = vunpack.c.l.b16 %v15_v14  ;;  %v54_v16 = vunpack.c.h.b16 %v15_v14  ;;  %v262_v17 = vld [vmem:[%s385_s1] sm:$0xff] }
   0xc   :  { %v270_v18 = vld [vmem:[%s385_s1 + $0x40] sm:$0xff] }
   0xd   :  { %v55_v19 = vpack.c.b16 %v53_v15, %v53_v15  ;;  %v56_v20 = vpack.c.b16 %v54_v16, %v54_v16  ;;  %v279_v21 = vld [vmem:[%s386_s2] ss:$0 sm:$0xff] }
   0xe   :  { %158 = vmatpush.bf16.msra.mxu0 %v266_v6 }
   0xf   :  { %171 = vmatpush.bf16.msra.mxu1 %v274_v7 }
  0x12   :  { %159 = vmatpush.bf16.msra.mxu0 %v265_v8 }
  0x13   :  { %172 = vmatpush.bf16.msra.mxu1 %v273_v9 }
  0x16   :  { %160 = vmatpush.bf16.msra.mxu0 %v264_v10 }
  0x17   :  { %173 = vmatpush.bf16.msra.mxu1 %v272_v11 }
  0x1a   :  { %161 = vmatpush.bf16.msra.mxu0 %v263_v12 }
  0x1b   :  { %174 = vmatpush.bf16.msra.mxu1 %v271_v13 }
  0x1e   :  { %162 = vmatpush.bf16.msra.mxu0 %v262_v17 }
  0x1f   :  { %175 = vmatpush.bf16.msra.mxu1 %v270_v18 }
  0x21   :  { %163 = vmatmul.bf16.vlgmr.msra.gmra.mxu0 %v55_v19 }
  0x22   :  { %176 = vmatmul.bf16.vlgmr.msra.gmra.mxu1 %v56_v20 }
  0x9e   :  { %v164_v22 = vpop.f32.mrf.mxu0 }
  0x9f   :  { %v177_v23 = vpop.f32.mrf.mxu1  ;;  %v165_v24 = vadd.f32 %v279_v21, %v164_v22 }
  0xa1   :  { %v178_v25 = vadd.f32 %v177_v23, %v165_v24 }
  0xa3   :  { %181 = vst [vmem:[#allocation2] sm:$0xff] %v178_v25 }
  0xa4   :  { %192 = dma.vmem_to_hbm [thread:$0]  %s188_s21, 128, %s190_s24, [#allocation3]  }
  0xa6   :  { %v166_v26 = vpop.f32.mrf.mxu0 }
  0xa7   :  { %v179_v27 = vpop.f32.mrf.mxu1 }
  0xa8   :  { %304 = dma.done.wait [#allocation3], 128  }
  0xa9   :  { %305 = vsyncadd [#allocation3], 4294967168 }
  0xaa   :  { %197 = vsyncpa [#allocation3], 1 }

</bundles_post_ra>
